<compile_context>
chip_gen: v5e
topology: v5e:2x2
jax: 0.10.0
libtpu: 0.0.40
codegen_flags: <defaults>
</compile_context>

<pallas_src>
import jax
import jax.numpy as jnp
import numpy as np
from jax.experimental import pallas as pl
from jax.experimental.pallas import tpu as pltpu


# ----------------------------------------------------------------------------
# Helpers
# ----------------------------------------------------------------------------
def _round_up(x: int, m: int) -> int:
    return ((x + m - 1) // m) * m


def _sublane_multiple(dtype) -> int:
    """Packed-sublane multiple for the input dtype (8 f32 / 16 bf16 / 32 i8)."""
    return {4: 8, 2: 16, 1: 32}.get(jnp.dtype(dtype).itemsize, 8)


def _vmem_budget_bytes() -> int:
    """Per-generation scoped-VMEM budget (~70% of physical, capped at 100 MiB)."""
    phys = 64 << 20  # conservative fallback (v7x per-TC physical VMEM)
    try:
        info = pltpu.get_tpu_info()
        phys = int(getattr(info, "vmem_capacity_bytes", phys))
    except Exception:
        pass
    return min(int(phys * 0.7), 100 << 20)


def _pick_tile_rows(rows: int, cols_p: int, dtype, budget: int,
                    max_block_bytes: int) -> int:
    """Byte-targeted row tile: biggest block that double-buffers under budget."""
    sub = _sublane_multiple(dtype)
    itemsize = jnp.dtype(dtype).itemsize
    row_bytes = cols_p * itemsize
    acc_bytes = 8 * cols_p * 4                       # (8, cols) f32 accumulator
    per_copy_cap = max((budget - acc_bytes - (1 << 20)) // 2, sub * row_bytes)
    block_bytes = min(max_block_bytes, per_copy_cap)
    tile_rows = max(block_bytes // row_bytes, sub)
    tile_rows -= tile_rows % sub
    tile_rows = max(tile_rows, sub)
    # Never bigger than the (padded) row count itself.
    tile_rows = min(tile_rows, _round_up(rows, sub))
    return tile_rows


# ----------------------------------------------------------------------------
# Auxiliary Pallas reduction kernel (loss-style full-array sum).
# NOT part of the reference semantics (CustomLoss.forward computes nothing).
# ----------------------------------------------------------------------------
def _sum_reduce_kernel(x_ref, o_ref, acc_ref):
    """One grid step: fold a (tile_rows, cols) block into an (8, cols) f32 acc."""
    k = pl.program_id(1)

    @pl.when(k == 0)
    def _init():
        acc_ref[...] = jnp.zeros_like(acc_ref)

    tile_rows, cols = x_ref.shape
    # Reduced axis sits above the (sublane, lane) tile -> pure VPU vreg adds.
    xf = x_ref[...].astype(jnp.float32).reshape(-1, 8, cols)
    acc_ref[...] += jnp.sum(xf, axis=0)

    @pl.when(k == pl.num_programs(1) - 1)
    def _finalize():
        # Single small XLU collapse (8 x cols), splat into a lane-dense block.
        total = jnp.sum(acc_ref[...])
        o_ref[...] = jnp.zeros_like(o_ref) + total


def pallas_sum(x: jax.Array, *, num_parallel: int = 2,
               max_block_bytes: int = 8 << 20,
               vmem_limit_bytes: int | None = None) -> jax.Array:
    """Sum a 2-D array to a single f32 scalar with a tiled Pallas reduction.

    Rows/cols are zero-padded (sum-neutral) to tiling multiples; the DMA stays
    in the input dtype and the upcast to f32 happens in-kernel.  The grid is
    (P, K): P "parallel" super-chunks (megacore on v7x) x K "arbitrary"
    reduction steps, with one (1, 8, 128) partial-output block per super-chunk.
    """
    assert x.ndim == 2, "expected a 2-D (rows, cols) array"
    rows, cols = x.shape
    cols_p = _round_up(cols, 128)

    budget = int(vmem_limit_bytes) if vmem_limit_bytes else _vmem_budget_bytes()
    tile_rows = _pick_tile_rows(rows, cols_p, x.dtype, budget, max_block_bytes)

    n_tiles = pl.cdiv(rows, tile_rows)
    n_par = max(1, min(num_parallel, n_tiles))
    k_steps = pl.cdiv(n_tiles, n_par)
    rows_p = n_par * k_steps * tile_rows

    if rows_p != rows or cols_p != cols:
        x = jnp.pad(x, ((0, rows_p - rows), (0, cols_p - cols)))

    out = pl.pallas_call(
        _sum_reduce_kernel,
        out_shape=jax.ShapeDtypeStruct((n_par, 8, 128), jnp.float32),
        grid_spec=pltpu.PrefetchScalarGridSpec(
            num_scalar_prefetch=0,
            grid=(n_par, k_steps),
            in_specs=[pl.BlockSpec(
                (tile_rows, cols_p),
                lambda p, k, _K=k_steps: (p * _K + k, 0))],
            # One lane-dense partial block per parallel super-chunk; constant
            # across the reduction axis (written once on the final k step).
            out_specs=pl.BlockSpec((1, 8, 128), lambda p, k: (p, 0, 0)),
            scratch_shapes=[pltpu.VMEM((8, cols_p), jnp.float32)],
        ),
        compiler_params=pltpu.CompilerParams(
            dimension_semantics=("parallel", "arbitrary"),
            vmem_limit_bytes=budget,
        ),
    )(x)

    # Tiny cross-super-chunk combine outside the kernel.
    return jnp.sum(out[:, 0, 0])


def zero_loss() -> jax.Array:
    """Constant 0.0 'loss' — compile-time constant, no kernel, no DMA."""
    return jnp.zeros((1, 1), jnp.float32)


# ----------------------------------------------------------------------------
# Faithful port of the PyTorch module.
# ----------------------------------------------------------------------------
class CustomLoss:
    """JAX port of the (empty) PyTorch CustomLoss module."""

    def __init__(self, *args, **kwargs) -> None:
        # Reference __init__ declares no parameters; nothing to initialize.
        pass

    def forward(self):
        # Exactly matches the PyTorch reference: no inputs, returns None.
        # TODO(synk): reference forward() is a bare `return`; there is no
        # computation to lower into Pallas.
        return


if __name__ == "__main__":
    key = jax.random.PRNGKey(0)
    k1, k2 = jax.random.split(key)

    # Case 1: f32, exactly tileable.  Small max_block_bytes forces a (2, 2)
    # grid so the parallel axis + accumulator init/finalize paths are hit.
    x1 = jax.random.normal(k1, (512, 128), dtype=jnp.float32)
    s1 = jax.block_until_ready(pallas_sum(x1, max_block_bytes=64 * 1024))
    ref1 = float(jnp.sum(x1, dtype=jnp.float32))
    np.testing.assert_allclose(float(s1), ref1, rtol=1e-3, atol=1e-1)

    # Case 2: bf16 with awkward shape (rows not a tiling multiple, cols not a
    # multiple of 128) — exercises zero-padding + 16-row sublane rounding.
    x2 = jax.random.normal(k2, (200, 192), dtype=jnp.float32).astype(jnp.bfloat16)
    s2 = jax.block_until_ready(pallas_sum(x2, max_block_bytes=64 * 1024))
    ref2 = float(jnp.sum(x2.astype(jnp.float32)))
    np.testing.assert_allclose(float(s2), ref2, rtol=1e-3, atol=1e-1)

    # Constant "zero loss" path: compile-time constant, no DMA, no pallas_call.
    zero = jax.block_until_ready(zero_loss())
    assert float(zero[0, 0]) == 0.0

    # Exercise the faithful module port: forward() must return None.
    module = CustomLoss()
    assert module.forward() is None

    print("KERNEL_OK")
</pallas_src>

<mosaic_0001>
module attributes {stable_mosaic.version = 11 : i64} {
  func.func @_sum_reduce_kernel(%arg0: i32, %arg1: i32, %arg2: memref<128x128xf32, #tpu.memory_space<vmem>>, %arg3: memref<1x8x128xf32, #tpu.memory_space<vmem>>, %arg4: memref<8x128xf32, #tpu.memory_space<vmem>>) attributes {dimension_semantics = [#tpu.dimension_semantics<parallel>, #tpu.dimension_semantics<arbitrary>], iteration_bounds = array<i64: 2, 2>, scalar_prefetch = 0 : i64, scratch_operands = 1 : i64, tpu.core_type = #tpu.core_type<tc>, window_params = [{transform_indices = @transform_0, window_bounds = array<i64: 128, 128>}, {transform_indices = @transform_1, window_bounds = array<i64: 1, 8, 128>}]} {
    %c0_i32 = arith.constant 0 : i32
    %0 = arith.cmpi eq, %arg1, %c0_i32 : i32
    %1 = arith.extui %0 : i1 to i32
    %c0_i32_0 = arith.constant 0 : i32
    %2 = arith.cmpi ne, %1, %c0_i32_0 : i32
    scf.if %2 {
      %cst_7 = arith.constant 0.000000e+00 : f32
      %12 = vector.broadcast %cst_7 : f32 to vector<8x128xf32>
      %c0_8 = arith.constant 0 : index
      %c0_9 = arith.constant 0 : index
      %13 = vector.load %arg4[%c0_8, %c0_9] : memref<8x128xf32, #tpu.memory_space<vmem>>, vector<8x128xf32>
      tpu.vector_store %arg4[%c0_8, %c0_9], %12 {strides = array<i32>} : memref<8x128xf32, #tpu.memory_space<vmem>>, vector<8x128xf32>,
    } else {
    }
    %c0 = arith.constant 0 : index
    %c0_1 = arith.constant 0 : index
    %3 = vector.load %arg2[%c0, %c0_1] : memref<128x128xf32, #tpu.memory_space<vmem>>, vector<128x128xf32>
    %4 = vector.shape_cast %3 : vector<128x128xf32> to vector<16x8x128xf32>
    %c0_2 = arith.constant 0 : index
    %c0_3 = arith.constant 0 : index
    %5 = vector.load %arg4[%c0_2, %c0_3] : memref<8x128xf32, #tpu.memory_space<vmem>>, vector<8x128xf32>
    %cst = arith.constant dense<0.000000e+00> : vector<8x128xf32>
    %6 = vector.multi_reduction <add>, %4, %cst [0] : vector<16x8x128xf32> to vector<8x128xf32>
    %7 = arith.addf %5, %6 : vector<8x128xf32>
    %c0_4 = arith.constant 0 : index
    %c0_5 = arith.constant 0 : index
    %8 = vector.load %arg4[%c0_4, %c0_5] : memref<8x128xf32, #tpu.memory_space<vmem>>, vector<8x128xf32>
    tpu.vector_store %arg4[%c0_4, %c0_5], %7 {strides = array<i32>} : memref<8x128xf32, #tpu.memory_space<vmem>>, vector<8x128xf32>,
    %c1_i32 = arith.constant 1 : i32
    %9 = arith.cmpi eq, %arg1, %c1_i32 : i32
    %10 = arith.extui %9 : i1 to i32
    %c0_i32_6 = arith.constant 0 : i32
    %11 = arith.cmpi ne, %10, %c0_i32_6 : i32
    scf.if %11 {
      %c0_7 = arith.constant 0 : index
      %c0_8 = arith.constant 0 : index
      %12 = vector.load %arg4[%c0_7, %c0_8] : memref<8x128xf32, #tpu.memory_space<vmem>>, vector<8x128xf32>
      %13 = vector.shape_cast %12 : vector<8x128xf32> to vector<1x8x128xf32>
      %cst_9 = arith.constant dense<0.000000e+00> : vector<1xf32>
      %14 = vector.multi_reduction <add>, %13, %cst_9 [1, 2] : vector<1x8x128xf32> to vector<1xf32>
      %15 = vector.shape_cast %14 : vector<1xf32> to vector<1x1x1xf32>
      %16 = vector.extract %15[0, 0, 0] : f32 from vector<1x1x1xf32>
      %cst_10 = arith.constant 0.000000e+00 : f32
      %17 = vector.broadcast %cst_10 : f32 to vector<1x8x128xf32>
      %18 = vector.broadcast %16 : f32 to vector<1x8x128xf32>
      %19 = arith.addf %17, %18 : vector<1x8x128xf32>
      %c0_11 = arith.constant 0 : index
      %c0_12 = arith.constant 0 : index
      %c0_13 = arith.constant 0 : index
      %20 = vector.load %arg3[%c0_11, %c0_12, %c0_13] : memref<1x8x128xf32, #tpu.memory_space<vmem>>, vector<1x8x128xf32>
      tpu.vector_store %arg3[%c0_11, %c0_12, %c0_13], %19 {strides = array<i32>} : memref<1x8x128xf32, #tpu.memory_space<vmem>>, vector<1x8x128xf32>,
    } else {
    }
    return
  }
  func.func @transform_0(%arg0: i32, %arg1: i32) -> (i32, i32) {
    %c2_i32 = arith.constant 2 : i32
    %0 = arith.muli %arg0, %c2_i32 : i32
    %1 = arith.addi %0, %arg1 : i32
    %c0_i32 = arith.constant 0 : i32
    %c0_i32_0 = arith.constant 0 : i32
    return %1, %c0_i32 : i32, i32
  }
  func.func @transform_1(%arg0: i32, %arg1: i32) -> (i32, i32, i32) {
    %c0_i32 = arith.constant 0 : i32
    %c0_i32_0 = arith.constant 0 : i32
    %c0_i32_1 = arith.constant 0 : i32
    return %arg0, %c0_i32, %c0_i32_0 : i32, i32, i32
  }
}

</mosaic_0001>

<bundles_post_ra>
// kernel: tpu_custom_call.1
= control target key start
LH: loop header
LB: loop body
LE: loop exit
PB: predicated region body
PF: predicated region fallthrough
CT: control target
= control target key end

     0   :  { %6 = vsyncpa [#allocation4], 0  ;;  %s810_s0 = inlined_call_operand.hbm [shape: f32[512,128], index: 0, kind: input, shape index: {}]   ;;  %s811_s1 = inlined_call_operand.hbm [shape: f32[2,8,128], index: 1, kind: output, shape index: {}]  }
   0x1   :  { %8 = vsyncpa [#allocation4 + $0x1], 0 }
   0x2   :  { %9 = vsyncpa [#allocation5], 0 }
   0x3   :  { %11 = vsyncpa [#allocation5 + $0x1], 0  ;;  %s607_s6 = smov 0   ;;  %s609_s7 = smov 0  }
   0x4   :  { %s611_s8 = smov 0   ;;  %s613_s9 = smov 0  }
   0x5   :  { %s615_s10 = smov 0   ;;  %s617_s11 = smov 0  }
   0x6   :  { %s619_s12 = smov 0   ;;  %s621_s13 = smov 0  }
   0x7   :  { %s623_s14 = smov 0   ;;  %s625_s15 = smov 0  }
   0x8   :  { %s627_s16 = smov 0  }
   0x9 LB: > { %s313_s17 = sadd.s32 4294967295, %s592_s16   ;;  %s314_s18 = sadd.s32 4294967294, %s592_s16   ;;  %s592_s16 = sphi %s627_s16, %s17_s16   ;;  %s588_s15 = sphi %s625_s15, %s831_s15   ;;  %s584_s14 = sphi %s623_s14, %s830_s14   ;;  %s580_s13 = sphi %s621_s13, %s829_s13   ;;  %s576_s12 = sphi %s619_s12, %s828_s12   ;;  %s572_s11 = sphi %s617_s11, %s827_s11   ;;  %s568_s10 = sphi %s615_s10, %s826_s10   ;;  %s564_s9 = sphi %s613_s9, %s825_s9   ;;  %s560_s8 = sphi %s611_s8, %s824_s8   ;;  %s556_s7 = sphi %s609_s7, %s823_s7   ;;  %s552_s6 = sphi %s607_s6, %s822_s6  }
   0xa   : > { %s26_s19 = sadd.s32 1, %s584_s14  ;;  %s29_s20 = sadd.s32 1, %s588_s15 }
   0xb   : > { %p27_p0 = scmp.ge.s32.totalorder %s26_s19, 2  ;;  %s315_s21 = sshll.u32 %s588_s15, 1 }
   0xc   : > { %s666_s22 = sadd.s32 %s584_s14, %s315_s21  ;;  %s40_s23 = sadd.s32 1, %s572_s11 }
   0xd   : > { %s833_s19 = smov (%p27_p0, %s26_s19), 0  ;;  %s835_s20 = smov (!%p27_p0, %s29_s20), %s588_s15 }
   0xe   : > { %814 = sst [smem:[#allocation9_spill]] %s833_s19  ;;  %p47_p1 = scmp.ne.s32.totalorder %s572_s11, %s568_s10 }
   0xf   : > { %p48_p2 = scmp.eq.s32.totalorder %s592_s16, 0  ;;  %p31_p3 = scmp.ge.s32.totalorder %s835_s20, 2 }
  0x10   : > { %p53_p4 = scmp.ne.s32.totalorder %s568_s10, %s564_s9  ;;  %p54_p6 = scmp.eq.s32.totalorder %s313_s17, 0 }
  0x11   : > { %p676_p5 = por %p48_p2, %p47_p1  ;;  %s837_s20 = smov (%p31_p3, %s835_s20), 0 }
  0x12   : > { %816 = sst [smem:[#allocation10_spill]] %s837_s20  ;;  %p682_p7 = por %p54_p6, %p53_p4 }
  0x13   : > { %s66_s26 = sadd.s32 1, %s560_s8  ;;  %s316_s27 = sshll.u32 %s837_s20, 1 }
  0x14   : > { %s63_s28 = ssub.s32 %s588_s15, %s837_s20  ;;  %s36_s29 = sadd.s32 %s316_s27, %s833_s19 }
  0x15   : > { %p64_p8 = scmp.eq.s32.totalorder %s63_s28, 0  ;;  %s37_s30 = ssub.s32 %s666_s22, %s36_s29 }
  0x16   : > { %p76_p9 = scmp.ne.s32.totalorder %s560_s8, %s556_s7  ;;  %p38_p10 = scmp.eq.s32.totalorder %s37_s30, 0 }
  0x17   : > { %p77_p11 = scmp.eq.s32.totalorder %s313_s17, 3  ;;  %p82_p13 = scmp.ne.s32.totalorder %s556_s7, %s552_s6 }
  0x18   : > { %s695_s2 = scalar_select %p64_p8, %s560_s8, %s66_s26  }
  0x19   : > { %s698_s3 = scalar_select %p38_p10, %s572_s11, %s40_s23  }
  0x1a   : > { %p700_p12 = por %p77_p11, %p76_p9  ;;  %p83_p0 = scmp.eq.s32.totalorder %s314_s18, 3 }
  0x1b   : > { %p347_p1 = scmp.lt.s32.totalorder %s592_s16, 4  ;;  %s103_s5 = sand.u32 1, %s572_s11  }
  0x1c   : > { %p710_p2 = por %p83_p0, %p82_p13  ;;  %s319_s17 = sshll.u32 %s103_s5, 7 }
  0x1d   : > { %s332_s21 = sshll.u32 %s666_s22, 7  ;;  %s107_s29 = scalar_lea.vmem [#allocation3], %s319_s17 }
  0x1e   : > { %s114_s27 = scalar_lea.hbm %s810_s0, %s332_s21  ;;  %s117_s30 = sshll.u32 %s107_s29, 4  ;;  %s118_s30 = int_to_ptr.vmem [resolvable:$true] %s117_s30 }
  0x1f   : > { %s115_s28 = sshll.u32 %s114_s27, 4  ;;  %p340_p3 = pnand %p347_p1, %p676_p5  ;;  %s116_s28 = int_to_ptr.hbm [resolvable:$true] %s115_s28 }
  0x20   : > { %p323_p4 = scmp.ge.s32.totalorder %s592_s16, 1  ;;  %p125_p6 = scmp.lt.s32.totalorder %s592_s16, 5 }
  0x21   : > { %s104_s18 = scalar_lea.sflag [#allocation4], %s103_s5  ;;  %s594_s20 = smov 128  }
  0x22   : > { %s595_s19 = smov 8   ;;  %p126_p8 = pnand %p323_p4, %p125_p6 }
  0x23   : > { %342 = dma.hbm_to_vmem [thread:$0]  (!%p340_p3), %s116_s28, 2048, %s118_s30, %s104_s18, %s594_s20, %s594_s20, %s595_s19  }
  0x24   : > { %129 = sbr.rel (%p126_p8) target bundleno = 287 (0x11f), region = 24  ;;  %s131_s22 = sand.u32 (!%p126_p8), 1, %s568_s10  }
  0x25   : > { %s324_s26 = sshll.u32 (!%p126_p8), %s131_s22, 7  ;;  %s132_s21 = scalar_lea.sflag (!%p126_p8), [#allocation4], %s131_s22 }
  0x26   : > { %s723_s23 = scalar_lea.vmem (!%p126_p8), [#allocation3], %s324_s26 }
  0x29   : > { %543 = dma.done.wait (%p682_p7), %s132_s21, 2048  }
  0x2a   : > { %545 = vsyncadd (%p682_p7), %s132_s21, 4294965248  ;;  %s152_s24 = sand.u32 1, %s556_s7   ;;  %p326_p5 = scmp.ne.s32.totalorder %s576_s12, 0 }
  0x2b   : > { %s732_s5 = sshll.u32 %s152_s24, 3 }
  0x2c   : > { %s154_s19 = scalar_lea.vmem [#allocation6], %s732_s5  ;;  %161 = sbr.rel (%p326_p5) target bundleno = 51 (0x33), region = 32 }
  0x31   : > { %v596_v0 = vmov 0.0  }
  0x32   : > { %162 = vst [vmem:[#allocation2] sm:$0xff] %v596_v0 }
  0x33 PF: > { %v163_v1 = vld [vmem:[%s723_s23] sm:$0xff]  ;;  %v164_v2 = vld [vmem:[%s723_s23 + $0x8] sm:$0xff]  ;;  %v165_v3 = vld [vmem:[%s723_s23 + $0x10] sm:$0xff]  ;;  %p327_p7 = scmp.ne.s32.totalorder %s576_s12, 1 }
  0x34   : > { %v180_v4 = vadd.f32 %v164_v2, %v163_v1  ;;  %v166_v5 = vld [vmem:[%s723_s23 + $0x18] sm:$0xff]  ;;  %v167_v7 = vld [vmem:[%s723_s23 + $0x20] sm:$0xff]  ;;  %v168_v9 = vld [vmem:[%s723_s23 + $0x28] sm:$0xff] }
  0x35   : > { %v169_v11 = vld [vmem:[%s723_s23 + $0x30] sm:$0xff]  ;;  %v170_v13 = vld [vmem:[%s723_s23 + $0x38] sm:$0xff]  ;;  %v171_v15 = vld [vmem:[%s723_s23 + $0x40] sm:$0xff] }
  0x36   : > { %v181_v6 = vadd.f32 %v180_v4, %v165_v3  ;;  %v172_v17 = vld [vmem:[%s723_s23 + $0x48] sm:$0xff]  ;;  %v173_v19 = vld [vmem:[%s723_s23 + $0x50] sm:$0xff]  ;;  %v174_v21 = vld [vmem:[%s723_s23 + $0x58] sm:$0xff] }
  0x37   : > { %v175_v23 = vld [vmem:[%s723_s23 + $0x60] sm:$0xff]  ;;  %v176_v25 = vld [vmem:[%s723_s23 + $0x68] sm:$0xff]  ;;  %v177_v27 = vld [vmem:[%s723_s23 + $0x70] sm:$0xff] }
  0x38   : > { %v182_v8 = vadd.f32 %v181_v6, %v166_v5  ;;  %v178_v29 = vld [vmem:[%s723_s23 + $0x78] sm:$0xff] }
  0x39   : > { %v179_v31 = vld [vmem:[#allocation2] sm:$0xff] }
  0x3a   : > { %v183_v10 = vadd.f32 %v182_v8, %v167_v7 }
  0x3c   : > { %v184_v12 = vadd.f32 %v183_v10, %v168_v9 }
  0x3e   : > { %v185_v14 = vadd.f32 %v184_v12, %v169_v11 }
  0x40   : > { %v186_v16 = vadd.f32 %v185_v14, %v170_v13 }
  0x42   : > { %v187_v18 = vadd.f32 %v186_v16, %v171_v15 }
  0x44   : > { %v188_v20 = vadd.f32 %v187_v18, %v172_v17 }
  0x46   : > { %v189_v22 = vadd.f32 %v188_v20, %v173_v19 }
  0x48   : > { %v190_v24 = vadd.f32 %v189_v22, %v174_v21 }
  0x4a   : > { %v191_v26 = vadd.f32 %v190_v24, %v175_v23 }
  0x4c   : > { %v192_v28 = vadd.f32 %v191_v26, %v176_v25 }
  0x4e   : > { %v193_v30 = vadd.f32 %v192_v28, %v177_v27 }
  0x50   : > { %v194_v32 = vadd.f32 %v193_v30, %v178_v29  ;;  %200 = sbr.rel (%p327_p7) target bundleno = 272 (0x110), region = 36 }
  0x52   : > { %v195_v33 = vadd.f32 %v194_v32, %v179_v31 }
  0x54   : > { %196 = vst [vmem:[#allocation2] sm:$0xff] %v195_v33 }
  0x5b   : > { %v201_v34 = vld [vmem:[#allocation2] sm:$0xff] }
  0x5c   : > { %202 = vadd.xlane.f32.xlu0 %v201_v34 }
  0xcf   : > { %v203_v35 = vpop.xlane.xlu0 %202 }
  0xd0   : > { %v204_v36 = vrot.slane %v203_v35, 4 }
  0xd2   : > { %v205_v37 = vadd.f32 %v204_v36, %v203_v35 }
  0xd4   : > { %v206_v38 = vrot.slane %v205_v37, 2 }
  0xd6   : > { %v207_v39 = vadd.f32 %v206_v38, %v205_v37 }
  0xd8   : > { %v208_v40 = vrot.slane %v207_v39, 1 }
  0xda   : > { %v209_v41 = vadd.f32 %v208_v40, %v207_v39 }
  0xdc   : > { %333 = vpush %v209_v41 }
 0x10d   : > { %s334_s20 = spop %333 }
 0x10e   : > { %v211_v42 = vstv %s334_s20 }
 0x10f   : > { %213 = vst [vmem:[%s154_s19] sm:$0xff] %v211_v42 }
 0x110 PF: > { %s329_s12 = sshll.u32 %s580_s13, 3  ;;  %s227_s28 = sshll.u32 %s154_s19, 4  ;;  %s228_s28 = int_to_ptr.vmem [resolvable:$true] %s227_s28 }
 0x111   : > { %s225_s27 = scalar_lea.hbm %s811_s1, %s329_s12  ;;  %s215_s30 = scalar_lea.sflag [#allocation5], %s152_s24 }
 0x112   : > { %s229_s29 = sshll.u32 %s225_s27, 4  ;;  %s490_s21 = scalar_lea.hbm %s811_s1, 16  ;;  %s230_s29 = int_to_ptr.hbm [resolvable:$true] %s229_s29 }
 0x113   : > { %s484_s18 = sshra.s32 %s230_s29, 4  ;;  %s485_s18 = int_to_ptr.hbm [resolvable:$true] %s484_s18 }
 0x114   : > { %s486_s22 = scalar_lea.hbm %s485_s18, 8  ;;  %p491_p13 = scmp.lt.s32.totalorder %s485_s18, %s811_s1 }
 0x115   : > { %p487_p9 = scmp.ne.s32.totalorder %s485_s18, %s486_s22  ;;  %p492_p0 = scmp.lt.s32.totalorder %s490_s21, %s486_s22 }
 0x117   : > { %p488_p10 = pnand %p487_p9, %p700_p12  ;;  %p493_p1 = por %p492_p0, %p491_p13 }
 0x119   : > { %p489_p11 = pneg %p488_p10 }
 0x11b   : > { %p494_p3 = pnand %p493_p1, %p489_p11 }
 0x11d   : > { %497 = shalt.err (!%p494_p3)
}
 0x11e   : > { %337 = dma.vmem_to_hbm [thread:$0]  (%p700_p12), %s228_s28, 128, %s230_s29, %s215_s30  }
 0x11f PF: > { %p348_p4 = scmp.ge.s32.totalorder %s592_s16, 2  ;;  %s241_s24 = sand.u32 1, %s552_s6  }
 0x120   : > { %s242_s5 = scalar_lea.sflag [#allocation5], %s241_s24 }
 0x121   : > { %p344_p6 = pnand %p348_p4, %p710_p2 }
 0x123   : > { %p345_p8 = pneg %p344_p6 }
 0x125   : > { %547 = dma.done.wait (%p345_p8), %s242_s5, 128  }
 0x126   : > { %549 = vsyncadd (%p345_p8), %s242_s5, 4294967168  ;;  %s17_s16 = sadd.s32 1, %s592_s16   ;;  %s820_s4 = sld [smem:[#allocation9_spill]] }
 0x127   : > { %p14_p5 = scmp.ge.s32.totalorder %s17_s16, 6   ;;  %s821_s19 = sld [smem:[#allocation10_spill]] }
 0x128   : > { %s822_s6 = smov %s556_s7  ;;  %s823_s7 = smov %s560_s8 }
 0x129   : > { %s824_s8 = smov %s695_s2  ;;  %s825_s9 = smov %s568_s10 }
 0x12a   : > { %s826_s10 = smov %s572_s11  ;;  %s827_s11 = smov %s698_s3 }
 0x12b   : > { %s828_s12 = smov %s584_s14  ;;  %s829_s13 = smov %s588_s15 }
 0x12c   : > { %s830_s14 = smov %s820_s4  ;;  %16 = sbr.rel (!%p14_p5) target bundleno = 9 (0x9), region = 77 }
 0x12d   : > { %s831_s15 = smov %s821_s19 }
 0x131   :  { %248 = vsyncpa [#allocation4], 1 }
 0x132   :  { %250 = vsyncpa [#allocation4 + $0x1], 1 }
 0x133   :  { %251 = vsyncpa [#allocation5], 1 }
 0x134   :  { %253 = vsyncpa [#allocation5 + $0x1], 1 }

</bundles_post_ra>
